<compile_context>
chip_gen: v5e
topology: v5e:2x2
jax: 0.10.0
libtpu: 0.0.40
codegen_flags: <defaults>
</compile_context>

<pallas_src>
import functools
import math

import jax
import jax.numpy as jnp
from jax import lax
from jax.experimental import pallas as pl
from jax.experimental.pallas import tpu as pltpu

GAMMA = 2.0  # module hyper-parameter (deterministic, set in-script)


def _normalize_kernel(f_ref, nf_ref):
    # F.normalize(p=2, dim=1, eps=1e-12):  x / max(||x||, 1e-12)
    #   == x * rsqrt(max(sum(x^2), 1e-24))   (sqrt is monotone)
    f = f_ref[...].astype(jnp.float32)
    sumsq = jnp.sum(f * f, axis=1, keepdims=True)
    nf_ref[...] = (f * lax.rsqrt(jnp.maximum(sumsq, 1e-24))).astype(nf_ref.dtype)


def _ncut_tile_kernel(nfr_ref, nfc_ref, labr_ref, labc_ref, out_ref,
                      acc_ap_ref, acc_an_ref, *, gamma):
    g = float(gamma)  # static Python float -> literal in the kernel
    i = pl.program_id(0)
    j = pl.program_id(1)

    @pl.when(jnp.logical_and(i == 0, j == 0))
    def _init():
        acc_ap_ref[...] = jnp.zeros_like(acc_ap_ref)
        acc_an_ref[...] = jnp.zeros_like(acc_an_ref)

    # bf16 x bf16 -> f32 accumulate, single MXU pass.  Contract the shared
    # last (lane) dim of both operands (B-transposed form), no explicit
    # transpose of the RHS tile.
    sim = lax.dot_general(
        nfr_ref[...], nfc_ref[...],
        dimension_numbers=(((1,), (1,)), ((), ())),
        preferred_element_type=jnp.float32,
    )                                                         # (TR, TC)

    # pos / neg masks; labels arrive pre-shaped -> broadcasted compare only.
    pos = labr_ref[...] == labc_ref[...]                      # (TR,1)==(1,TC)

    # Masked logsumexp partial sums via the analytic bound |sim| <= 1:
    #   pos terms need exp(-g*sim - g), neg terms exp(g*sim - g);
    # one exp over the tile, arguments in [-2g, ~0] (no overflow).
    t = jnp.where(pos, -sim, sim)
    e = jnp.exp(g * t - g)
    s_ap = jnp.sum(jnp.where(pos, e, 0.0), keepdims=True)     # (1, 1)
    s_all = jnp.sum(e, keepdims=True)                         # (1, 1)

    acc_ap_ref[...] += s_ap
    acc_an_ref[...] += s_all - s_ap

    @pl.when(jnp.logical_and(i == pl.num_programs(0) - 1,
                             j == pl.num_programs(1) - 1))
    def _finalize():
        # lse(-A[pos]) + lse(A[neg]) = 2g + log(sum_ap) + log(sum_an).
        # An empty mask gives log(0) = -inf, matching torch.logsumexp over an
        # empty selection (softplus(-inf) = 0).
        z = (2.0 * g) + jnp.log(acc_ap_ref[...]) + jnp.log(acc_an_ref[...])
        # Numerically stable softplus.
        loss = (jnp.maximum(z, 0.0) + jnp.log(1.0 + jnp.exp(-jnp.abs(z)))) / 8.0
        out_ref[...] = loss


def _pick_tile(n, want):
    """Largest tile <= want that divides n and is layout-legal (mult of 8)."""
    t = min(want, n)
    if n % t != 0:
        t = math.gcd(t, n)
        if t != n and t % 8 != 0:
            t = n  # fall back to a monolithic (full-extent) tile
    return t


def ncut_loss(feat, labels, gamma=GAMMA, row_tile=512, col_tile=512):
    """feat: (N, D) float, labels: (N,) int -> scalar float32 loss.

    Default 512-wide tiles hit the measured sweet spot; on 128 MiB-VMEM parts
    (v5e/v6e) they could be doubled, on v7x they already fit comfortably.
    """
    n, d = feat.shape
    labels = labels.astype(jnp.int32)
    lab_col = labels.reshape(n, 1)
    lab_row = labels.reshape(1, n)

    tr = _pick_tile(n, row_tile)
    tc = _pick_tile(n, col_tile)

    # ---- pre-pass: normalize rows once, emit bf16 for single-pass MXU ------
    nf = pl.pallas_call(
        _normalize_kernel,
        out_shape=jax.ShapeDtypeStruct((n, d), jnp.bfloat16),
        grid=(n // tr,),
        in_specs=[pl.BlockSpec((tr, d), lambda i: (i, 0))],
        out_specs=pl.BlockSpec((tr, d), lambda i: (i, 0)),
        compiler_params=pltpu.CompilerParams(
            dimension_semantics=("parallel",)),
    )(feat)

    # ---- main tiled reduction over the (N, N) similarity matrix ------------
    kernel = functools.partial(_ncut_tile_kernel, gamma=float(gamma))
    out = pl.pallas_call(
        kernel,
        out_shape=jax.ShapeDtypeStruct((1, 1), jnp.float32),
        grid=(n // tr, n // tc),
        in_specs=[
            pl.BlockSpec((tr, d), lambda i, j: (i, 0)),   # nf row tile
            pl.BlockSpec((tc, d), lambda i, j: (j, 0)),   # nf col tile
            pl.BlockSpec((tr, 1), lambda i, j: (i, 0)),   # labels (rows)
            pl.BlockSpec((1, tc), lambda i, j: (0, j)),   # labels (cols)
        ],
        out_specs=pl.BlockSpec((1, 1), lambda i, j: (0, 0)),
        scratch_shapes=[pltpu.VMEM((1, 1), jnp.float32),   # sum over pos
                        pltpu.VMEM((1, 1), jnp.float32)],  # sum over neg
        compiler_params=pltpu.CompilerParams(
            dimension_semantics=("arbitrary", "arbitrary"),
            vmem_limit_bytes=32 * 1024 * 1024),
    )(nf, nf, lab_col, lab_row)
    return out[0, 0]


def ncut_loss_ref(feat, labels, gamma=GAMMA):
    """Pure-JAX reference mirroring the PyTorch forward (f32, HIGHEST)."""
    f = feat.astype(jnp.float32)
    nrm = jnp.maximum(jnp.linalg.norm(f, axis=1, keepdims=True), 1e-12)
    nf = f / nrm
    aff = gamma * jnp.dot(nf, nf.T, precision=lax.Precision.HIGHEST)
    pos = labels[:, None] == labels[None, :]
    neg = ~pos
    ap = jnp.where(pos, -aff, -jnp.inf)
    an = jnp.where(neg, aff, -jnp.inf)
    lse = lambda x: jax.scipy.special.logsumexp(x.reshape(-1))
    return jax.nn.softplus(lse(ap) + lse(an)) / 8.0


if __name__ == "__main__":
    # N = 64 matches the module's eye(64) mask; N*N divisible by 8 as required
    # by the .view(8, -1) in the original code.
    N, D = 64, 32
    key = jax.random.PRNGKey(0)
    kf, kl = jax.random.split(key)
    feat = jax.random.normal(kf, (N, D), dtype=jnp.float32)
    labels = jax.random.randint(kl, (N,), 0, 4, dtype=jnp.int32)

    loss = jax.block_until_ready(ncut_loss(feat, labels))
    ref = jax.block_until_ready(ncut_loss_ref(feat, labels))

    assert jnp.isfinite(loss), "loss is not finite"
    # rtol/atol loosened vs. the f32 HIGHEST reference because the kernel uses
    # bf16 MXU operands (single-pass matmul), per the performance review.
    assert jnp.allclose(loss, ref, rtol=2e-2, atol=2e-2), (loss, ref)
    print("KERNEL_OK")
</pallas_src>

<mosaic_0001>
module attributes {stable_mosaic.version = 11 : i64} {
  func.func @_normalize_kernel(%arg0: i32, %arg1: memref<64x32xf32, #tpu.memory_space<vmem>>, %arg2: memref<64x32xbf16, #tpu.memory_space<vmem>>) attributes {dimension_semantics = [#tpu.dimension_semantics<parallel>], iteration_bounds = array<i64: 1>, scalar_prefetch = 0 : i64, scratch_operands = 0 : i64, tpu.core_type = #tpu.core_type<tc>, window_params = [{transform_indices = @transform_0, window_bounds = array<i64: 64, 32>}, {transform_indices = @transform_1, window_bounds = array<i64: 64, 32>}]} {
    %c0 = arith.constant 0 : index
    %c0_0 = arith.constant 0 : index
    %0 = vector.load %arg1[%c0, %c0_0] : memref<64x32xf32, #tpu.memory_space<vmem>>, vector<64x32xf32>
    %1 = arith.mulf %0, %0 : vector<64x32xf32>
    %cst = arith.constant dense<0.000000e+00> : vector<64xf32>
    %2 = vector.multi_reduction <add>, %1, %cst [1] : vector<64x32xf32> to vector<64xf32>
    %3 = vector.shape_cast %2 : vector<64xf32> to vector<64x1xf32>
    %cst_1 = arith.constant 1.000000e-24 : f32
    %4 = vector.broadcast %cst_1 : f32 to vector<64x1xf32>
    %5 = arith.maximumf %3, %4 : vector<64x1xf32>
    %6 = math.rsqrt %5 : vector<64x1xf32>
    %7 = vector.broadcast %6 : vector<64x1xf32> to vector<64x32xf32>
    %8 = arith.mulf %0, %7 : vector<64x32xf32>
    %9 = arith.truncf %8 : vector<64x32xf32> to vector<64x32xbf16>
    %c0_2 = arith.constant 0 : index
    %c0_3 = arith.constant 0 : index
    %10 = vector.load %arg2[%c0_2, %c0_3] : memref<64x32xbf16, #tpu.memory_space<vmem>>, vector<64x32xbf16>
    tpu.vector_store %arg2[%c0_2, %c0_3], %9 {strides = array<i32>} : memref<64x32xbf16, #tpu.memory_space<vmem>>, vector<64x32xbf16>,
    return
  }
  func.func @transform_0(%arg0: i32) -> (i32, i32) {
    %c0_i32 = arith.constant 0 : i32
    %c0_i32_0 = arith.constant 0 : i32
    return %arg0, %c0_i32 : i32, i32
  }
  func.func @transform_1(%arg0: i32) -> (i32, i32) {
    %c0_i32 = arith.constant 0 : i32
    %c0_i32_0 = arith.constant 0 : i32
    return %arg0, %c0_i32 : i32, i32
  }
}

</mosaic_0001>

<bundles_post_ra>
// kernel: tpu_custom_call.1
= control target key start
LH: loop header
LB: loop body
LE: loop exit
PB: predicated region body
PF: predicated region fallthrough
CT: control target
= control target key end

     0   :  { %vm24_vm0 = vcmask 261120   ;;  %vm153_vm1 = vcmask 257024   ;;  %s322_s0 = inlined_call_operand.vmem [shape: f32[64,32], index: 0, kind: input, shape index: {}]   ;;  %s323_s1 = inlined_call_operand.vmem [shape: bf16[64,32], index: 1, kind: output, shape index: {}]  }
   0x1   :  { %v195_v0 = vld [vmem:[%s322_s0 + $0x20] sm:$0xff]  ;;  %v200_v1 = vld [vmem:[%s322_s0 + $0x10] sm:$0xff]  ;;  %v216_v6 = vld [vmem:[%s322_s0 + $0x28] sm:$0xff] }
   0x2   :  { %v205_v2 = vld [vmem:[%s322_s0] sm:$0xff]  ;;  %v20_v3 = vmul.f32 %v195_v0, %v195_v0  ;;  %v18_v4 = vmul.f32 %v200_v1, %v200_v1  ;;  %v221_v7 = vld [vmem:[%s322_s0 + $0x18] sm:$0xff]  ;;  %v229_v11 = vld [vmem:[%s322_s0 + $0x8] sm:$0xff]  ;;  %v21_v12 = vmul.f32 %v216_v6, %v216_v6 }
   0x3   :  { %v16_v5 = vmul.f32 %v205_v2, %v205_v2  ;;  %v19_v13 = vmul.f32 %v221_v7, %v221_v7  ;;  %v17_v14 = vmul.f32 %v229_v11, %v229_v11  ;;  %v243_v18 = vld [vmem:[%s322_s0 + $0x38] sm:$0xff]  ;;  %v248_v19 = vld [vmem:[%s322_s0 + $0x30] sm:$0xff] }
   0x4   :  { %v37_v8 = vsel %vm24_vm0, %v20_v3, 0.0  ;;  %v31_v9 = vsel %vm24_vm0, %v18_v4, 0.0  ;;  %v40_v15 = vsel %vm24_vm0, %v21_v12, 0.0  ;;  %v23_v20 = vmul.f32 %v243_v18, %v243_v18 }
   0x5   :  { %v25_v10 = vsel %vm24_vm0, %v16_v5, 0.0  ;;  %38 = vadd.xlane.f32.xlu2 %v37_v8  ;;  %32 = vadd.xlane.f32.xlu1 %v31_v9  ;;  %v34_v16 = vsel %vm24_vm0, %v19_v13, 0.0  ;;  %v28_v17 = vsel %vm24_vm0, %v17_v14, 0.0  ;;  %v22_v21 = vmul.f32 %v248_v19, %v248_v19 }
   0x6   :  { %26 = vadd.xlane.f32.xlu0 %v25_v10  ;;  %v46_v22 = vsel %vm24_vm0, %v23_v20, 0.0 }
   0x7   :  { %v43_v23 = vsel %vm24_vm0, %v22_v21, 0.0 }
   0xd   :  { %41 = vadd.xlane.f32.xlu2 %v40_v15  ;;  %35 = vadd.xlane.f32.xlu1 %v34_v16 }
   0xe   :  { %29 = vadd.xlane.f32.xlu0 %v28_v17 }
  0x15   :  { %47 = vadd.xlane.f32.xlu1 %v46_v22 }
  0x16   :  { %44 = vadd.xlane.f32.xlu0 %v43_v23 }
  0x78   :  { %v39_v24 = vpop.xlane.xlu2 %38  ;;  %v33_v25 = vpop.xlane.xlu1 %32 }
  0x79   :  { %v53_v26 = vmax.f32 %v39_v24, 1e-24  ;;  %v51_v27 = vmax.f32 %v33_v25, 1e-24  ;;  %v27_v28 = vpop.xlane.xlu0 %26 }
  0x7a   :  { %v49_v29 = vmax.f32 %v27_v28, 1e-24 }
  0x7b   :  { %166 = vrsqrt.f32 %v53_v26  ;;  %vm103_vm2 = vweird.f32 %v53_v26  ;;  %vm83_vm4 = vweird.f32 %v51_v27 }
  0x7c   :  { %168 = vrsqrt.f32 %v51_v27  ;;  %vm63_vm8 = vweird.f32 %v49_v29 }
  0x7d   :  { %170 = vrsqrt.f32 %v49_v29 }
  0x80   :  { %v42_v30 = vpop.xlane.xlu2 %41  ;;  %v36_v31 = vpop.xlane.xlu1 %35 }
  0x81   :  { %v167_v32 = vpop.eup %166  ;;  %v256_v33 = vmax.f32 %v42_v30, 1e-24  ;;  %v258_v34 = vmax.f32 %v36_v31, 1e-24  ;;  %v30_v35 = vpop.xlane.xlu0 %29 }
  0x82   :  { %v169_v36 = vpop.eup %168  ;;  %v98_v37 = vmul.f32 %v167_v32, %v53_v26  ;;  %v260_v38 = vmax.f32 %v30_v35, 1e-24  ;;  %vm104_vm3 = vweird.f32 %v167_v32 }
  0x83   :  { %v171_v39 = vpop.eup %170  ;;  %v78_v40 = vmul.f32 %v169_v36, %v51_v27  ;;  %172 = vrsqrt.f32 %v256_v33  ;;  %vm84_vm5 = vweird.f32 %v169_v36  ;;  %vm105_vm7 = vmor %vm103_vm2, %vm104_vm3  ;;  %vm113_vm11 = vweird.f32 %v256_v33 }
  0x84   :  { %v99_v41 = vmul.f32 %v167_v32, %v98_v37  ;;  %v58_v42 = vmul.f32 %v171_v39, %v49_v29  ;;  %174 = vrsqrt.f32 %v258_v34  ;;  %vm64_vm6 = vweird.f32 %v171_v39  ;;  %vm85_vm9 = vmor %vm83_vm4, %vm84_vm5 }
  0x85   :  { %v79_v43 = vmul.f32 %v169_v36, %v78_v40  ;;  %176 = vrsqrt.f32 %v260_v38  ;;  %vm65_vm10 = vmor %vm63_vm8, %vm64_vm6  ;;  %vm93_vm0 = vweird.f32 %v258_v34  ;;  %vm73_vm3 = vweird.f32 %v260_v38 }
  0x86   :  { %v100_v44 = vmul.f32 0.5, %v99_v41  ;;  %v59_v45 = vmul.f32 %v171_v39, %v58_v42 }
  0x87   :  { %v80_v46 = vmul.f32 0.5, %v79_v43 }
  0x88   :  { %v101_v47 = vsub.f32 1.5, %v100_v44  ;;  %v60_v48 = vmul.f32 0.5, %v59_v45  ;;  %v48_v49 = vpop.xlane.xlu1 %47 }
  0x89   :  { %v173_v50 = vpop.eup %172  ;;  %v81_v51 = vsub.f32 1.5, %v80_v46  ;;  %v265_v52 = vmax.f32 %v48_v49, 1e-24  ;;  %v45_v8 = vpop.xlane.xlu0 %44 }
  0x8a   :  { %v175_v53 = vpop.eup %174  ;;  %v102_v54 = vmul.f32 %v167_v32, %v101_v47  ;;  %v61_v55 = vsub.f32 1.5, %v60_v48  ;;  %v108_v56 = vmul.f32 %v173_v50, %v256_v33  ;;  %vm114_vm12 = vweird.f32 %v173_v50 }
  0x8b   :  { %v177_v57 = vpop.eup %176  ;;  %v82_v58 = vmul.f32 %v169_v36, %v81_v51  ;;  %v88_v59 = vmul.f32 %v175_v53, %v258_v34  ;;  %178 = vrsqrt.f32 %v265_v52  ;;  %v55_v21 = vmax.f32 %v45_v8, 1e-24  ;;  %vm115_vm15 = vmor %vm113_vm11, %vm114_vm12 }
  0x8c   :  { %v106_v60 = vsel %vm105_vm7, %v167_v32, %v102_v54  ;;  %v62_v61 = vmul.f32 %v171_v39, %v61_v55  ;;  %v109_v62 = vmul.f32 %v173_v50, %v108_v56  ;;  %v68_v63 = vmul.f32 %v177_v57, %v260_v38 }
  0x8d   :  { %v141_v3 = vmul.f32 %v106_v60, %v195_v0  ;;  %v86_v4 = vsel %vm85_vm9, %v169_v36, %v82_v58  ;;  %v89_v5 = vmul.f32 %v175_v53, %v88_v59  ;;  %vm94_vm13 = vweird.f32 %v175_v53 }
  0x8e   :  { %v139_v9 = vmul.f32 %v86_v4, %v200_v1  ;;  %v66_v10 = vsel %vm65_vm10, %v171_v39, %v62_v61  ;;  %v110_v12 = vmul.f32 0.5, %v109_v62  ;;  %v69_v13 = vmul.f32 %v177_v57, %v68_v63  ;;  %vm95_vm2 = vmor %vm93_vm0, %vm94_vm13 }
  0x8f   :  { %v149_v14 = vpack.c.bf16 %v141_v3, %v141_v3  ;;  %v137_v15 = vmul.f32 %v66_v10, %v205_v2  ;;  %v90_v16 = vmul.f32 0.5, %v89_v5  ;;  %vm74_vm14 = vweird.f32 %v177_v57 }
  0x90   :  { %v147_v17 = vpack.c.bf16 %v139_v9, %v139_v9  ;;  %v111_v20 = vsub.f32 1.5, %v110_v12  ;;  %v70_v0 = vmul.f32 0.5, %v69_v13  ;;  %180 = vrsqrt.f32 %v55_v21  ;;  %vm75_vm4 = vmor %vm73_vm3, %vm74_vm14 }
  0x91   :  { %v179_v22 = vpop.eup %178  ;;  %158 = vst.msk [vmem:[%s323_s1 + $0x10] sm:$0xf] %vm153_vm1, %v149_v14  ;;  %v145_v23 = vpack.c.bf16 %v137_v15, %v137_v15  ;;  %v91_v1 = vsub.f32 1.5, %v90_v16  ;;  %vm133_vm6 = vweird.f32 %v265_v52  ;;  %vm123_vm9 = vweird.f32 %v55_v21 }
  0x92   :  { %156 = vst.msk [vmem:[%s323_s1 + $0x8] sm:$0xf] %vm153_vm1, %v147_v17  ;;  %v112_v2 = vmul.f32 %v173_v50, %v111_v20  ;;  %v71_v24 = vsub.f32 1.5, %v70_v0  ;;  %v128_v25 = vmul.f32 %v179_v22, %v265_v52  ;;  %vm134_vm5 = vweird.f32 %v179_v22 }
  0x93   :  { %154 = vst.msk [vmem:[%s323_s1] sm:$0xf] %vm153_vm1, %v145_v23  ;;  %v92_v26 = vmul.f32 %v175_v53, %v91_v1  ;;  %vm135_vm7 = vmor %vm133_vm6, %vm134_vm5 }
  0x94   :  { %v116_v27 = vsel %vm115_vm15, %v173_v50, %v112_v2  ;;  %v72_v28 = vmul.f32 %v177_v57, %v71_v24  ;;  %v129_v29 = vmul.f32 %v179_v22, %v128_v25 }
  0x95   :  { %v142_v30 = vmul.f32 %v116_v27, %v216_v6  ;;  %v96_v31 = vsel %vm95_vm2, %v175_v53, %v92_v26 }
  0x96   :  { %v140_v32 = vmul.f32 %v96_v31, %v221_v7  ;;  %v76_v35 = vsel %vm75_vm4, %v177_v57, %v72_v28  ;;  %v130_v36 = vmul.f32 0.5, %v129_v29  ;;  %v181_v40 = vpop.eup %180 }
  0x97   :  { %v150_v33 = vpack.c.bf16 %v142_v30, %v142_v30  ;;  %v138_v37 = vmul.f32 %v76_v35, %v229_v11  ;;  %v118_v7 = vmul.f32 %v181_v40, %v55_v21  ;;  %vm124_vm8 = vweird.f32 %v181_v40 }
  0x98   :  { %v148_v39 = vpack.c.bf16 %v140_v32, %v140_v32  ;;  %v131_v34 = vsub.f32 1.5, %v130_v36  ;;  %vm125_vm10 = vmor %vm123_vm9, %vm124_vm8 }
  0x99   :  { %159 = vst.msk [vmem:[%s323_s1 + $0x14] sm:$0xf] %vm153_vm1, %v150_v33  ;;  %v146_v38 = vpack.c.bf16 %v138_v37, %v138_v37  ;;  %v119_v41 = vmul.f32 %v181_v40, %v118_v7 }
  0x9a   :  { %157 = vst.msk [vmem:[%s323_s1 + $0xc] sm:$0xf] %vm153_vm1, %v148_v39  ;;  %v132_v6 = vmul.f32 %v179_v22, %v131_v34 }
  0x9b   :  { %155 = vst.msk [vmem:[%s323_s1 + $0x4] sm:$0xf] %vm153_vm1, %v146_v38  ;;  %v120_v43 = vmul.f32 0.5, %v119_v41 }
  0x9c   :  { %v136_v11 = vsel %vm135_vm7, %v179_v22, %v132_v6 }
  0x9d   :  { %v144_v42 = vmul.f32 %v136_v11, %v243_v18  ;;  %v121_v45 = vsub.f32 1.5, %v120_v43 }
  0x9f   :  { %v152_v44 = vpack.c.bf16 %v144_v42, %v144_v42  ;;  %v122_v46 = vmul.f32 %v181_v40, %v121_v45 }
  0xa1   :  { %161 = vst.msk [vmem:[%s323_s1 + $0x1c] sm:$0xf] %vm153_vm1, %v152_v44  ;;  %v126_v47 = vsel %vm125_vm10, %v181_v40, %v122_v46 }
  0xa2   :  { %v143_v48 = vmul.f32 %v126_v47, %v248_v19 }
  0xa4   :  { %v151_v49 = vpack.c.bf16 %v143_v48, %v143_v48 }
  0xa6   :  { %160 = vst.msk [vmem:[%s323_s1 + $0x18] sm:$0xf] %vm153_vm1, %v151_v49 }

</bundles_post_ra>
